<compile_context>
chip_gen: v6e
topology: v6e:2x2x1
jax: 0.10.0
libtpu: 0.0.40
codegen_flags: <defaults>
</compile_context>

<pallas_src>
import functools

import jax
import jax.numpy as jnp
from jax.experimental import pallas as pl
from jax.experimental.pallas import tpu as pltpu

LANE = 128
ROW_ALIGN = 16          # bf16 packs 16 rows per vreg -> never tile below 16


def _round_up(n, m):
    return ((n + m - 1) // m) * m


# -----------------------------------------------------------------------------
# Kernel body: fused (matmul + bias [+ ReLU]) chain on one batch tile.
# -----------------------------------------------------------------------------
def _mlp_kernel(x_ref, *refs, num_layers, bias_offsets, bias_widths, mxu_dtype):
    """refs = (w0, ..., w_{L-1}, b_all, o_ref)

      w_i   : [in_pad_i, out_pad_i]  (mxu_dtype, resident across grid steps)
      b_all : [1, sum(out_pad_i)]    (f32, all biases concatenated)
      o_ref : [TB, out_pad_last]
    """
    o_ref = refs[-1]
    b_ref = refs[-2]
    w_refs = refs[:-2]
    assert len(w_refs) == num_layers

    h = x_ref[...].astype(mxu_dtype)
    out = None
    for i in range(num_layers):
        # MXU matmul: bf16 inputs, f32 accumulation.
        out = jnp.dot(h, w_refs[i][...].astype(mxu_dtype),
                      preferred_element_type=jnp.float32)
        off, width = bias_offsets[i], bias_widths[i]
        out = out + b_ref[:, off:off + width]          # f32 bias add (VPU)
        if i < num_layers - 1:
            # ReLU in f32 (v5e has no bf16 VALU); value-identical to bf16 ReLU.
            out = jnp.maximum(out, 0.0)
            h = out.astype(mxu_dtype)                  # back to MXU dtype
    o_ref[...] = out.astype(o_ref.dtype)


# -----------------------------------------------------------------------------
# One-time parameter preparation (hoisted out of the per-call forward path).
# -----------------------------------------------------------------------------
def prepare_params(params, *, mxu_dtype=jnp.bfloat16):
    """params: list of (W[in,out], b[out] or [1,out]).  Pads feature dims to
    multiples of 128, casts weights to the MXU dtype, and concatenates all
    (zero-padded) biases into one lane-dense f32 row."""
    in_dims = [int(w.shape[0]) for w, _ in params]
    out_dims = [int(w.shape[1]) for w, _ in params]
    in_pad = [_round_up(d, LANE) for d in in_dims]
    out_pad = [_round_up(d, LANE) for d in out_dims]

    ws = []
    for i, (w, _) in enumerate(params):
        wp = jnp.pad(w, ((0, in_pad[i] - in_dims[i]),
                         (0, out_pad[i] - out_dims[i])))
        ws.append(wp.astype(mxu_dtype))

    b_rows, bias_offsets, off = [], [], 0
    for i, (_, b) in enumerate(params):
        b2 = jnp.reshape(b, (1, -1)).astype(jnp.float32)
        b_rows.append(jnp.pad(b2, ((0, 0), (0, out_pad[i] - out_dims[i]))))
        bias_offsets.append(off)
        off += out_pad[i]
    b_all = jnp.concatenate(b_rows, axis=1)

    return dict(ws=tuple(ws), b_all=b_all,
                in_dims=tuple(in_dims), out_dims=tuple(out_dims),
                in_pad=tuple(in_pad), out_pad=tuple(out_pad),
                bias_offsets=tuple(bias_offsets), total_bias=int(off),
                mxu_dtype=mxu_dtype)


# -----------------------------------------------------------------------------
# Helpers: BlockSpecs / VMEM budget / dimension semantics.
# -----------------------------------------------------------------------------
def _resident_spec(block_shape, single_buffered):
    """Spec for weights / bias: constant index_map (fetched once).  With
    Buffered(1) Mosaic keeps a single VMEM buffer instead of double-buffering
    data that is never re-fetched."""
    index_map = lambda g: (0, 0)
    if single_buffered and hasattr(pl, "Buffered"):
        try:
            return pl.BlockSpec(block_shape, index_map,
                                pipeline_mode=pl.Buffered(1))
        except TypeError:
            pass
    return pl.BlockSpec(block_shape, index_map)


def _vmem_limit_bytes():
    try:
        cap = int(pltpu.get_tpu_info().vmem_capacity_bytes)
    except Exception:
        cap = 64 * 1024 * 1024          # conservative (v7x per-TC size)
    # Never request the full physical VMEM: leave headroom for Mosaic internal
    # scratch and DMA descriptors (matters most on v7x's 64 MiB per TC).
    return int(min(0.8 * cap, 96 * 1024 * 1024))


def _dimension_semantics(num_grid_steps):
    """Shard the batch grid across TensorCores on multi-TC chips (v7x); fall
    back to plain "parallel" on 1-TC chips or if detection is unavailable."""
    if num_grid_steps >= 2 and hasattr(pltpu, "CORE_PARALLEL"):
        try:
            info = pltpu.get_tpu_info()
            n_cores = 1
            for attr in ("num_cores", "num_tensorcores", "tensorcore_count"):
                v = getattr(info, attr, None)
                if v:
                    n_cores = max(n_cores, int(v))
            if n_cores >= 2:
                return (pltpu.CORE_PARALLEL,)
        except Exception:
            pass
    return ("parallel",)


# -----------------------------------------------------------------------------
# Forward pass.
# -----------------------------------------------------------------------------
def mlp_forward(x, prepared, *, out_dtype=None):
    """x: [batch, input_dim]; prepared: output of prepare_params()."""
    batch, input_dim = x.shape
    ws, b_all = prepared["ws"], prepared["b_all"]
    in_dims, out_dims = prepared["in_dims"], prepared["out_dims"]
    in_pad, out_pad = prepared["in_pad"], prepared["out_pad"]
    bias_offsets, total_bias = prepared["bias_offsets"], prepared["total_bias"]
    mxu_dtype = prepared["mxu_dtype"]
    num_layers = len(ws)
    assert in_dims[0] == input_dim
    out_dtype = x.dtype if out_dtype is None else out_dtype

    mxu_itemsize = jnp.dtype(mxu_dtype).itemsize
    out_itemsize = jnp.dtype(out_dtype).itemsize

    vmem_limit = _vmem_limit_bytes()
    budget = int(0.6 * vmem_limit)

    # Resident (single-buffered) weights + bias row.
    resident = sum(int(w.size) for w in ws) * mxu_itemsize + total_bias * 4
    max_width = max(in_pad + out_pad)
    # Per-row VMEM: double-buffered x tile, double-buffered out tile, plus the
    # live f32 accumulator + f32 intermediate + bf16 recast of the widest layer.
    per_row = (2 * in_pad[0] * mxu_itemsize
               + 2 * out_pad[-1] * out_itemsize
               + (4 + 4 + mxu_itemsize) * max_width)

    # Batch-tile selection: floor 16 (bf16 row pack); prefer 256/128 multiples
    # (MXU geometry on v6e/v7x / v5e); never collapse toward 8-row tiles.
    tb_cap = max(_round_up(batch, ROW_ALIGN), ROW_ALIGN)
    tb = None
    for cand in (2048, 1024, 512, 256, 128, 64, 32, ROW_ALIGN):
        if resident + cand * per_row <= budget:
            tb = cand
            break
    if tb is None:
        # TODO(synk): stream weights through VMEM (emit_pipeline over the
        # layer / K dim) instead of keeping them resident when they exceed the
        # per-core VMEM budget (very large MLPs on v7x).
        raise ValueError(
            f"resident weights ({resident / 2**20:.1f} MiB) exceed the VMEM "
            f"budget ({budget / 2**20:.1f} MiB); weight streaming not "
            f"implemented")
    tb = max(min(tb, tb_cap), ROW_ALIGN)
    batch_pad = _round_up(batch, tb)
    grid = (batch_pad // tb,)

    # Pad activations and cast to the MXU dtype (halves activation HBM traffic).
    x_p = jnp.pad(x, ((0, batch_pad - batch), (0, in_pad[0] - input_dim)))
    x_p = x_p.astype(mxu_dtype)

    flops = 2 * batch_pad * sum(ip * op for ip, op in zip(in_pad, out_pad))
    bytes_accessed = (int(x_p.size) * mxu_itemsize
                      + batch_pad * out_pad[-1] * out_itemsize
                      + sum(int(w.size) for w in ws) * mxu_itemsize
                      + total_bias * 4)

    kernel = functools.partial(
        _mlp_kernel,
        num_layers=num_layers,
        bias_offsets=tuple(bias_offsets),
        bias_widths=tuple(out_pad),
        mxu_dtype=mxu_dtype)

    def _build(single_buffered, dim_sem):
        in_specs = [pl.BlockSpec((tb, in_pad[0]), lambda g: (g, 0))]
        for i in range(num_layers):
            in_specs.append(
                _resident_spec((in_pad[i], out_pad[i]), single_buffered))
        in_specs.append(_resident_spec((1, total_bias), single_buffered))
        out_spec = pl.BlockSpec((tb, out_pad[-1]), lambda g: (g, 0))
        return pl.pallas_call(
            kernel,
            out_shape=jax.ShapeDtypeStruct((batch_pad, out_pad[-1]), out_dtype),
            grid_spec=pltpu.PrefetchScalarGridSpec(
                num_scalar_prefetch=0,
                grid=grid,
                in_specs=in_specs,
                out_specs=out_spec),
            compiler_params=pltpu.CompilerParams(
                dimension_semantics=dim_sem,
                vmem_limit_bytes=vmem_limit),
            cost_estimate=pl.CostEstimate(
                flops=flops, transcendentals=0, bytes_accessed=bytes_accessed),
        )

    try:
        out_padded = _build(True, _dimension_semantics(grid[0]))(x_p, *ws, b_all)
    except Exception:
        # Conservative fallback if this jax/Mosaic build rejects Buffered(1)
        # or core-level semantics: default double-buffering + "parallel".
        out_padded = _build(False, ("parallel",))(x_p, *ws, b_all)

    return out_padded[:batch, :out_dims[-1]]


# -----------------------------------------------------------------------------
# Parameter init (matches nn.Linear U(-1/sqrt(fan_in), 1/sqrt(fan_in)) and the
# MLPNetwork layer layout) and pure-JAX references.
# -----------------------------------------------------------------------------
def init_mlp_params(key, input_dim, hidden_dim, num_hidden_layers, output_dim,
                    dtype=jnp.float32):
    dims = [input_dim] + [hidden_dim] * num_hidden_layers + [output_dim]
    params = []
    for i in range(len(dims) - 1):
        fan_in, fan_out = dims[i], dims[i + 1]
        key, kw, kb = jax.random.split(key, 3)
        bound = 1.0 / jnp.sqrt(fan_in)
        w = jax.random.uniform(kw, (fan_in, fan_out), dtype, -bound, bound)
        b = jax.random.uniform(kb, (1, fan_out), dtype, -bound, bound)
        params.append((w, b))
    return params


def mlp_reference(x, params, mxu_dtype=None):
    """Pure-JAX reference.  With mxu_dtype set it matches the kernel's
    bf16-input / f32-accumulate arithmetic exactly."""
    n = len(params)
    if mxu_dtype is None:
        h = x
        for i, (w, b) in enumerate(params):
            h = h @ w + jnp.reshape(b, (1, -1))
            if i < n - 1:
                h = jnp.maximum(h, 0.0)
        return h
    h = x.astype(mxu_dtype)
    out = None
    for i, (w, b) in enumerate(params):
        out = jnp.dot(h, w.astype(mxu_dtype), preferred_element_type=jnp.float32)
        out = out + jnp.reshape(b, (1, -1)).astype(jnp.float32)
        if i < n - 1:
            out = jnp.maximum(out, 0.0)
            h = out.astype(mxu_dtype)
    return out.astype(x.dtype)


if __name__ == "__main__":
    # Small config consistent with the module's structure.
    batch = 12
    input_dim = 16
    hidden_dim = 32
    num_hidden_layers = 2
    output_dim = 8

    key = jax.random.PRNGKey(0)
    key, kx = jax.random.split(key)
    x = jax.random.normal(kx, (batch, input_dim), dtype=jnp.float32)

    params = init_mlp_params(key, input_dim, hidden_dim, num_hidden_layers,
                             output_dim)
    prepared = prepare_params(params)      # one-time pad / cast / bias concat

    out = mlp_forward(x, prepared)
    out = jax.block_until_ready(out)
    assert out.shape == (batch, output_dim)

    # Exact-arithmetic reference (bf16 MXU inputs, f32 accumulation).
    ref_bf16 = mlp_reference(x, params, mxu_dtype=jnp.bfloat16)
    assert jnp.allclose(out, ref_bf16, atol=2e-3, rtol=2e-3), \
        "mismatch vs bf16-matched reference"

    # Sanity check vs full-f32 reference (loose tolerance for bf16 rounding).
    ref_f32 = mlp_reference(x, params)
    assert jnp.allclose(out, ref_f32, atol=5e-2, rtol=5e-2), \
        "mismatch vs f32 reference"

    print("KERNEL_OK")
</pallas_src>

<mosaic_0001>
module attributes {stable_mosaic.version = 11 : i64} {
  func.func @_mlp_kernel(%arg0: i32, %arg1: memref<16x128xbf16, #tpu.memory_space<vmem>>, %arg2: memref<128x128xbf16, #tpu.memory_space<vmem>>, %arg3: memref<128x128xbf16, #tpu.memory_space<vmem>>, %arg4: memref<128x128xbf16, #tpu.memory_space<vmem>>, %arg5: memref<1x384xf32, #tpu.memory_space<vmem>>, %arg6: memref<16x128xf32, #tpu.memory_space<vmem>>) attributes {dimension_semantics = [#tpu.dimension_semantics<parallel>], iteration_bounds = array<i64: 1>, scalar_prefetch = 0 : i64, scratch_operands = 0 : i64, tpu.core_type = #tpu.core_type<tc>, window_params = [{transform_indices = @transform_0, window_bounds = array<i64: 16, 128>}, {pipeline_mode = #tpu.pipeline_mode<synchronous>, transform_indices = @transform_1, window_bounds = array<i64: 128, 128>}, {pipeline_mode = #tpu.pipeline_mode<synchronous>, transform_indices = @transform_2, window_bounds = array<i64: 128, 128>}, {pipeline_mode = #tpu.pipeline_mode<synchronous>, transform_indices = @transform_3, window_bounds = array<i64: 128, 128>}, {pipeline_mode = #tpu.pipeline_mode<synchronous>, transform_indices = @transform_4, window_bounds = array<i64: 1, 384>}, {transform_indices = @transform_5, window_bounds = array<i64: 16, 128>}]} {
    %c0 = arith.constant 0 : index
    %c0_0 = arith.constant 0 : index
    %0 = vector.load %arg1[%c0, %c0_0] : memref<16x128xbf16, #tpu.memory_space<vmem>>, vector<16x128xbf16>
    %c0_1 = arith.constant 0 : index
    %c0_2 = arith.constant 0 : index
    %1 = vector.load %arg2[%c0_1, %c0_2] : memref<128x128xbf16, #tpu.memory_space<vmem>>, vector<128x128xbf16>
    %cst = arith.constant dense<0.000000e+00> : vector<16x128xf32>
    %2 = tpu.matmul %0, %1, %cst {dimension_numbers = #tpu.dot_dimension_numbers<[1], [0], [0], [1], [0, 0, 1, 1], [], []>} : vector<16x128xbf16>, vector<128x128xbf16>, vector<16x128xf32> -> vector<16x128xf32>
    %c0_3 = arith.constant 0 : index
    %c0_4 = arith.constant 0 : index
    %3 = vector.load %arg5[%c0_3, %c0_4] : memref<1x384xf32, #tpu.memory_space<vmem>>, vector<1x128xf32>
    %4 = vector.broadcast %3 : vector<1x128xf32> to vector<16x128xf32>
    %5 = arith.addf %2, %4 : vector<16x128xf32>
    %cst_5 = arith.constant 0.000000e+00 : f32
    %6 = vector.broadcast %cst_5 : f32 to vector<16x128xf32>
    %7 = arith.maximumf %5, %6 : vector<16x128xf32>
    %8 = arith.truncf %7 : vector<16x128xf32> to vector<16x128xbf16>
    %c0_6 = arith.constant 0 : index
    %c0_7 = arith.constant 0 : index
    %9 = vector.load %arg3[%c0_6, %c0_7] : memref<128x128xbf16, #tpu.memory_space<vmem>>, vector<128x128xbf16>
    %cst_8 = arith.constant dense<0.000000e+00> : vector<16x128xf32>
    %10 = tpu.matmul %8, %9, %cst_8 {dimension_numbers = #tpu.dot_dimension_numbers<[1], [0], [0], [1], [0, 0, 1, 1], [], []>} : vector<16x128xbf16>, vector<128x128xbf16>, vector<16x128xf32> -> vector<16x128xf32>
    %c0_9 = arith.constant 0 : index
    %c128 = arith.constant 128 : index
    %11 = vector.load %arg5[%c0_9, %c128] : memref<1x384xf32, #tpu.memory_space<vmem>>, vector<1x128xf32>
    %12 = vector.broadcast %11 : vector<1x128xf32> to vector<16x128xf32>
    %13 = arith.addf %10, %12 : vector<16x128xf32>
    %cst_10 = arith.constant 0.000000e+00 : f32
    %14 = vector.broadcast %cst_10 : f32 to vector<16x128xf32>
    %15 = arith.maximumf %13, %14 : vector<16x128xf32>
    %16 = arith.truncf %15 : vector<16x128xf32> to vector<16x128xbf16>
    %c0_11 = arith.constant 0 : index
    %c0_12 = arith.constant 0 : index
    %17 = vector.load %arg4[%c0_11, %c0_12] : memref<128x128xbf16, #tpu.memory_space<vmem>>, vector<128x128xbf16>
    %cst_13 = arith.constant dense<0.000000e+00> : vector<16x128xf32>
    %18 = tpu.matmul %16, %17, %cst_13 {dimension_numbers = #tpu.dot_dimension_numbers<[1], [0], [0], [1], [0, 0, 1, 1], [], []>} : vector<16x128xbf16>, vector<128x128xbf16>, vector<16x128xf32> -> vector<16x128xf32>
    %c0_14 = arith.constant 0 : index
    %c256 = arith.constant 256 : index
    %19 = vector.load %arg5[%c0_14, %c256] : memref<1x384xf32, #tpu.memory_space<vmem>>, vector<1x128xf32>
    %20 = vector.broadcast %19 : vector<1x128xf32> to vector<16x128xf32>
    %21 = arith.addf %18, %20 : vector<16x128xf32>
    %c0_15 = arith.constant 0 : index
    %c0_16 = arith.constant 0 : index
    %22 = vector.load %arg6[%c0_15, %c0_16] : memref<16x128xf32, #tpu.memory_space<vmem>>, vector<16x128xf32>
    tpu.vector_store %arg6[%c0_15, %c0_16], %21 {strides = array<i32>} : memref<16x128xf32, #tpu.memory_space<vmem>>, vector<16x128xf32>,
    return
  }
  func.func @transform_0(%arg0: i32) -> (i32, i32) {
    %c0_i32 = arith.constant 0 : i32
    %c0_i32_0 = arith.constant 0 : i32
    return %arg0, %c0_i32 : i32, i32
  }
  func.func @transform_1(%arg0: i32) -> (i32, i32) {
    %c0_i32 = arith.constant 0 : i32
    %c0_i32_0 = arith.constant 0 : i32
    %c0_i32_1 = arith.constant 0 : i32
    return %c0_i32, %c0_i32_0 : i32, i32
  }
  func.func @transform_2(%arg0: i32) -> (i32, i32) {
    %c0_i32 = arith.constant 0 : i32
    %c0_i32_0 = arith.constant 0 : i32
    %c0_i32_1 = arith.constant 0 : i32
    return %c0_i32, %c0_i32_0 : i32, i32
  }
  func.func @transform_3(%arg0: i32) -> (i32, i32) {
    %c0_i32 = arith.constant 0 : i32
    %c0_i32_0 = arith.constant 0 : i32
    %c0_i32_1 = arith.constant 0 : i32
    return %c0_i32, %c0_i32_0 : i32, i32
  }
  func.func @transform_4(%arg0: i32) -> (i32, i32) {
    %c0_i32 = arith.constant 0 : i32
    %c0_i32_0 = arith.constant 0 : i32
    %c0_i32_1 = arith.constant 0 : i32
    return %c0_i32, %c0_i32_0 : i32, i32
  }
  func.func @transform_5(%arg0: i32) -> (i32, i32) {
    %c0_i32 = arith.constant 0 : i32
    %c0_i32_0 = arith.constant 0 : i32
    return %arg0, %c0_i32 : i32, i32
  }
}

module attributes {stable_mosaic.version = 11 : i64} {
  func.func @_mlp_kernel(%arg0: i32, %arg1: memref<16x128xbf16, #tpu.memory_space<vmem>>, %arg2: memref<128x128xbf16, #tpu.memory_space<vmem>>, %arg3: memref<128x128xbf16, #tpu.memory_space<vmem>>, %arg4: memref<128x128xbf16, #tpu.memory_space<vmem>>, %arg5: memref<1x384xf32, #tpu.memory_space<vmem>>, %arg6: memref<16x128xf32, #tpu.memory_space<vmem>>) attributes {dimension_semantics = [#tpu.dimension_semantics<parallel>], iteration_bounds = array<i64: 1>, scalar_prefetch = 0 : i64, scratch_operands = 0 : i64, tpu.core_type = #tpu.core_type<tc>, window_params = [{transform_indices = @transform_0, window_bounds = array<i64: 16, 128>}, {pipeline_mode = #tpu.pipeline_mode<synchronous>, transform_indices = @transform_1, window_bounds = array<i64: 128, 128>}, {pipeline_mode = #tpu.pipeline_mode<synchronous>, transform_indices = @transform_2, window_bounds = array<i64: 128, 128>}, {pipeline_mode = #tpu.pipeline_mode<synchronous>, transform_indices = @transform_3, window_bounds = array<i64: 128, 128>}, {pipeline_mode = #tpu.pipeline_mode<synchronous>, transform_indices = @transform_4, window_bounds = array<i64: 1, 384>}, {transform_indices = @transform_5, window_bounds = array<i64: 16, 128>}]} {
    %c0 = arith.constant 0 : index
    %c0_0 = arith.constant 0 : index
    %0 = vector.load %arg1[%c0, %c0_0] : memref<16x128xbf16, #tpu.memory_space<vmem>>, vector<16x128xbf16>
    %c0_1 = arith.constant 0 : index
    %c0_2 = arith.constant 0 : index
    %1 = vector.load %arg2[%c0_1, %c0_2] : memref<128x128xbf16, #tpu.memory_space<vmem>>, vector<128x128xbf16>
    %cst = arith.constant dense<0.000000e+00> : vector<16x128xf32>
    %2 = tpu.matmul %0, %1, %cst {dimension_numbers = #tpu.dot_dimension_numbers<[1], [0], [0], [1], [0, 0, 1, 1], [], []>} : vector<16x128xbf16>, vector<128x128xbf16>, vector<16x128xf32> -> vector<16x128xf32>
    %c0_3 = arith.constant 0 : index
    %c0_4 = arith.constant 0 : index
    %3 = vector.load %arg5[%c0_3, %c0_4] : memref<1x384xf32, #tpu.memory_space<vmem>>, vector<1x128xf32>
    %4 = vector.broadcast %3 : vector<1x128xf32> to vector<16x128xf32>
    %5 = arith.addf %2, %4 : vector<16x128xf32>
    %cst_5 = arith.constant 0.000000e+00 : f32
    %6 = vector.broadcast %cst_5 : f32 to vector<16x128xf32>
    %7 = arith.maximumf %5, %6 : vector<16x128xf32>
    %8 = arith.truncf %7 : vector<16x128xf32> to vector<16x128xbf16>
    %c0_6 = arith.constant 0 : index
    %c0_7 = arith.constant 0 : index
    %9 = vector.load %arg3[%c0_6, %c0_7] : memref<128x128xbf16, #tpu.memory_space<vmem>>, vector<128x128xbf16>
    %cst_8 = arith.constant dense<0.000000e+00> : vector<16x128xf32>
    %10 = tpu.matmul %8, %9, %cst_8 {dimension_numbers = #tpu.dot_dimension_numbers<[1], [0], [0], [1], [0, 0, 1, 1], [], []>} : vector<16x128xbf16>, vector<128x128xbf16>, vector<16x128xf32> -> vector<16x128xf32>
    %c0_9 = arith.constant 0 : index
    %c128 = arith.constant 128 : index
    %11 = vector.load %arg5[%c0_9, %c128] : memref<1x384xf32, #tpu.memory_space<vmem>>, vector<1x128xf32>
    %12 = vector.broadcast %11 : vector<1x128xf32> to vector<16x128xf32>
    %13 = arith.addf %10, %12 : vector<16x128xf32>
    %cst_10 = arith.constant 0.000000e+00 : f32
    %14 = vector.broadcast %cst_10 : f32 to vector<16x128xf32>
    %15 = arith.maximumf %13, %14 : vector<16x128xf32>
    %16 = arith.truncf %15 : vector<16x128xf32> to vector<16x128xbf16>
    %c0_11 = arith.constant 0 : index
    %c0_12 = arith.constant 0 : index
    %17 = vector.load %arg4[%c0_11, %c0_12] : memref<128x128xbf16, #tpu.memory_space<vmem>>, vector<128x128xbf16>
    %cst_13 = arith.constant dense<0.000000e+00> : vector<16x128xf32>
    %18 = tpu.matmul %16, %17, %cst_13 {dimension_numbers = #tpu.dot_dimension_numbers<[1], [0], [0], [1], [0, 0, 1, 1], [], []>} : vector<16x128xbf16>, vector<128x128xbf16>, vector<16x128xf32> -> vector<16x128xf32>
    %c0_14 = arith.constant 0 : index
    %c256 = arith.constant 256 : index
    %19 = vector.load %arg5[%c0_14, %c256] : memref<1x384xf32, #tpu.memory_space<vmem>>, vector<1x128xf32>
    %20 = vector.broadcast %19 : vector<1x128xf32> to vector<16x128xf32>
    %21 = arith.addf %18, %20 : vector<16x128xf32>
    %c0_15 = arith.constant 0 : index
    %c0_16 = arith.constant 0 : index
    %22 = vector.load %arg6[%c0_15, %c0_16] : memref<16x128xf32, #tpu.memory_space<vmem>>, vector<16x128xf32>
    tpu.vector_store %arg6[%c0_15, %c0_16], %21 {strides = array<i32>} : memref<16x128xf32, #tpu.memory_space<vmem>>, vector<16x128xf32>,
    return
  }
  func.func @transform_0(%arg0: i32) -> (i32, i32) {
    %c0_i32 = arith.constant 0 : i32
    %c0_i32_0 = arith.constant 0 : i32
    return %arg0, %c0_i32 : i32, i32
  }
  func.func @transform_1(%arg0: i32) -> (i32, i32) {
    %c0_i32 = arith.constant 0 : i32
    %c0_i32_0 = arith.constant 0 : i32
    %c0_i32_1 = arith.constant 0 : i32
    return %c0_i32, %c0_i32_0 : i32, i32
  }
  func.func @transform_2(%arg0: i32) -> (i32, i32) {
    %c0_i32 = arith.constant 0 : i32
    %c0_i32_0 = arith.constant 0 : i32
    %c0_i32_1 = arith.constant 0 : i32
    return %c0_i32, %c0_i32_0 : i32, i32
  }
  func.func @transform_3(%arg0: i32) -> (i32, i32) {
    %c0_i32 = arith.constant 0 : i32
    %c0_i32_0 = arith.constant 0 : i32
    %c0_i32_1 = arith.constant 0 : i32
    return %c0_i32, %c0_i32_0 : i32, i32
  }
  func.func @transform_4(%arg0: i32) -> (i32, i32) {
    %c0_i32 = arith.constant 0 : i32
    %c0_i32_0 = arith.constant 0 : i32
    %c0_i32_1 = arith.constant 0 : i32
    return %c0_i32, %c0_i32_0 : i32, i32
  }
  func.func @transform_5(%arg0: i32) -> (i32, i32) {
    %c0_i32 = arith.constant 0 : i32
    %c0_i32_0 = arith.constant 0 : i32
    return %arg0, %c0_i32 : i32, i32
  }
}

</mosaic_0001>

<bundles_post_ra>
// kernel: tpu_custom_call.1
= control target key start
LH: loop header
LB: loop body
LE: loop exit
PB: predicated region body
PF: predicated region fallthrough
CT: control target
= control target key end

     0   :  { %10 = vsyncpa [#allocation3], 0  ;;  %s814_s0 = inlined_call_operand.hbm [shape: bf16[16,128], index: 0, kind: input, shape index: {}]   ;;  %s815_s1 = inlined_call_operand.hbm [shape: bf16[128,128], index: 1, kind: input, shape index: {}]   ;;  %s816_s2 = inlined_call_operand.hbm [shape: bf16[128,128], index: 2, kind: input, shape index: {}]   ;;  %s817_s3 = inlined_call_operand.hbm [shape: bf16[128,128], index: 3, kind: input, shape index: {}]   ;;  %s818_s4 = inlined_call_operand.vmem [shape: f32[1,384], index: 4, kind: input, shape index: {}]   ;;  %s819_s5 = inlined_call_operand.hbm [shape: f32[16,128], index: 5, kind: output, shape index: {}]  }
   0x1   :  { %11 = vsyncpa [#allocation6], 0 }
   0x2   :  { %12 = vsyncpa [#allocation9], 0 }
   0x3   :  { %13 = vsyncpa [#allocation4], 0  ;;  %s707_s18 = smov [#allocation5]   ;;  %s708_s20 = smov [#allocation2]  }
   0x4   :  { %s31_s19 = sshll.u32 %s707_s18, 4  ;;  %s19_s21 = sshll.u32 %s708_s20, 4  ;;  %s32_s19 = int_to_ptr.vmem [resolvable:$true] %s31_s19  ;;  %s20_s21 = int_to_ptr.vmem [resolvable:$true] %s19_s21 }
   0x5   :  { %s607_s22 = scalar_lea.vmem %s32_s19, 1024  ;;  %p612_p1 = scmp.lt.s32.totalorder %s32_s19, %s32_s19 }
   0x6   :  { %p608_p0 = scmp.ne.s32.totalorder %s32_s19, %s607_s22  ;;  %p613_p2 = scmp.lt.s32.totalorder %s607_s22, %s607_s22 }
   0x8   :  { %p614_p3 = por %p613_p2, %p612_p1 }
   0xa   :  { %p615_p4 = pnand %p614_p3, %p608_p0 }
   0xc   :  { %618 = shalt.err (!%p615_p4)
}
   0xd   :  { %s709_s23 = smov 64   ;;  %s710_s24 = smov 4  }
   0xe   :  { %37 = dma.hbm_to_vmem [thread:$0]  %s815_s1, 1024, %s32_s19, [#allocation6], %s709_s23, %s709_s23, %s710_s24  }
   0xf   :  { %s627_s27 = scalar_lea.vmem %s20_s21, 128  ;;  %p632_p6 = scmp.lt.s32.totalorder %s20_s21, %s20_s21 }
  0x10   :  { %p628_p5 = scmp.ne.s32.totalorder %s20_s21, %s627_s27  ;;  %p633_p7 = scmp.lt.s32.totalorder %s627_s27, %s627_s27 }
  0x12   :  { %p634_p8 = por %p633_p7, %p632_p6 }
  0x14   :  { %p635_p9 = pnand %p634_p8, %p628_p5 }
  0x16   :  { %638 = shalt.err (!%p635_p9)
}
  0x17   :  { %25 = dma.hbm_to_vmem [thread:$0]  %s814_s0, 128, %s20_s21, [#allocation3], %s709_s23, %s709_s23, %s710_s24  }
  0x18   :  { %s711_s30 = smov [#allocation7]   ;;  %s712_s7 = smov [#allocation8]  }
  0x19   :  { %s43_s6 = sshll.u32 %s711_s30, 4  ;;  %s55_s8 = sshll.u32 %s712_s7, 4  ;;  %s44_s6 = int_to_ptr.vmem [resolvable:$true] %s43_s6  ;;  %s56_s8 = int_to_ptr.vmem [resolvable:$true] %s55_s8 }
  0x1a   :  { %s647_s1 = scalar_lea.vmem %s44_s6, 1024  ;;  %p652_p11 = scmp.lt.s32.totalorder %s44_s6, %s44_s6 }
  0x1b   :  { %p648_p10 = scmp.ne.s32.totalorder %s44_s6, %s647_s1  ;;  %p653_p12 = scmp.lt.s32.totalorder %s647_s1, %s647_s1 }
  0x1d   :  { %p654_p13 = por %p653_p12, %p652_p11 }
  0x1f   :  { %p655_p0 = pnand %p654_p13, %p648_p10 }
  0x21   :  { %658 = shalt.err (!%p655_p0)
}
  0x22   :  { %49 = dma.hbm_to_vmem [thread:$0]  %s816_s2, 1024, %s44_s6, [#allocation6], %s709_s23, %s709_s23, %s710_s24  }
  0x23   :  { %s667_s0 = scalar_lea.vmem %s56_s8, 1024  ;;  %p672_p2 = scmp.lt.s32.totalorder %s56_s8, %s56_s8 }
  0x24   :  { %p668_p1 = scmp.ne.s32.totalorder %s56_s8, %s667_s0  ;;  %p673_p3 = scmp.lt.s32.totalorder %s667_s0, %s667_s0 }
  0x26   :  { %p674_p4 = por %p673_p3, %p672_p2 }
  0x28   :  { %p675_p5 = pnand %p674_p4, %p668_p1 }
  0x2a   :  { %678 = shalt.err (!%p675_p5)
}
  0x2b   :  { %61 = dma.hbm_to_vmem [thread:$0]  %s817_s3, 1024, %s56_s8, [#allocation9], %s709_s23, %s709_s23, %s710_s24  }
  0x2c   :  { %699 = dma.done.wait [#allocation3], 128  }
  0x2d   :  { %700 = vsyncadd [#allocation3], 4294967168 }
  0x2e   :  { %701 = dma.done.wait [#allocation6], 2048  }
  0x2f   :  { %702 = vsyncadd [#allocation6], 4294965248 }
  0x30   :  { %703 = dma.done.wait [#allocation9], 1024  }
  0x31   :  { %704 = vsyncadd [#allocation9], 4294966272  ;;  %v713_v0 = vmov 0.0   ;;  %vm714_vm0 = vmmov 0   ;;  %v574_v1 = vld [vmem:[#allocation5 + $0x38] sm:$0xff]   ;;  %v575_v2 = vld [vmem:[#allocation5 + $0x30] sm:$0xff]  }
  0x32   :  { %503 = vmatprep.subr.bf16.mxu0 %v713_v0  ;;  %519 = vmatprep.mubr.msk.bf16.mxu0 %vm714_vm0, %v713_v0  ;;  %v576_v3 = vld [vmem:[#allocation5 + $0x28] sm:$0xff]   ;;  %v583_v4 = vld [vmem:[#allocation7 + $0x38] sm:$0xff]   ;;  %v577_v5 = vld [vmem:[#allocation5 + $0x20] sm:$0xff]   ;;  %s715_s17 = smov [#allocation10]  }
  0x33   :  { %523 = vmatprep.subr.bf16.mxu1 %v713_v0  ;;  %539 = vmatprep.mubr.msk.bf16.mxu1 %vm714_vm0, %v713_v0  ;;  %v584_v6 = vld [vmem:[#allocation7 + $0x30] sm:$0xff]   ;;  %v578_v7 = vld [vmem:[#allocation5 + $0x18] sm:$0xff]   ;;  %v585_v8 = vld [vmem:[#allocation7 + $0x28] sm:$0xff]   ;;  %s434_s18 = sshll.u32 %s715_s17, 4  ;;  %s435_s18 = int_to_ptr.vmem [resolvable:$true] %s434_s18 }
  0x34   :  { %504 = vmatpush3.bf16.msra.mxu0 %v574_v1  ;;  %524 = vmatpush3.bf16.msra.mxu1 %v583_v4  ;;  %v579_v9 = vld [vmem:[#allocation5 + $0x10] sm:$0xff]   ;;  %v586_v10 = vld [vmem:[#allocation7 + $0x20] sm:$0xff]   ;;  %v580_v11 = vld [vmem:[#allocation5 + $0x8] sm:$0xff]   ;;  %s679_s19 = scalar_lea.vmem %s435_s18, 256  ;;  %p684_p7 = scmp.lt.s32.totalorder %s435_s18, %s435_s18 }
  0x35   :  { %505 = vmatprep.subr.bf16.mxu0 %v713_v0  ;;  %525 = vmatprep.subr.bf16.mxu1 %v713_v0  ;;  %v587_v12 = vld [vmem:[#allocation7 + $0x18] sm:$0xff]   ;;  %v581_v13 = vld [vmem:[#allocation5] sm:$0xff]   ;;  %v588_v15 = vld [vmem:[#allocation7 + $0x10] sm:$0xff]   ;;  %p680_p6 = scmp.ne.s32.totalorder %s435_s18, %s679_s19  ;;  %p685_p8 = scmp.lt.s32.totalorder %s679_s19, %s679_s19 }
  0x36   :  { %v582_v14 = vld [vmem:[#allocation2] sm:$0xff]   ;;  %v589_v16 = vld [vmem:[#allocation7 + $0x8] sm:$0xff]   ;;  %v590_v17 = vld [vmem:[#allocation7] sm:$0xff]  }
  0x37   :  { %v591_v18 = vld [vmem:[#allocation8 + $0x38] sm:$0xff]   ;;  %v592_v19 = vld [vmem:[#allocation8 + $0x30] sm:$0xff]   ;;  %v593_v20 = vld [vmem:[#allocation8 + $0x28] sm:$0xff]   ;;  %p686_p9 = por %p685_p8, %p684_p7 }
  0x38   :  { %506 = vmatpush3.bf16.msra.mxu0 %v575_v2  ;;  %526 = vmatpush3.bf16.msra.mxu1 %v584_v6  ;;  %v594_v21 = vld [vmem:[#allocation8 + $0x20] sm:$0xff]   ;;  %v595_v22 = vld [vmem:[#allocation8 + $0x18] sm:$0xff]   ;;  %v596_v33 = vld [vmem:[#allocation8 + $0x10] sm:$0xff]  }
  0x39   :  { %507 = vmatprep.subr.bf16.mxu0 %v713_v0  ;;  %527 = vmatprep.subr.bf16.mxu1 %v713_v0  ;;  %v448_v23 = vld [vmem:[%s818_s4] ss:$0 sm:$0xff]  ;;  %v597_v34 = vld [vmem:[#allocation8 + $0x8] sm:$0xff]   ;;  %v598_v35 = vld [vmem:[#allocation8] sm:$0xff]   ;;  %p687_p10 = pnand %p686_p9, %p680_p6 }
  0x3a   :  { %v458_v36 = vld [vmem:[%s818_s4 + $0x1] ss:$0 sm:$0xff]  ;;  %v467_v46 = vld [vmem:[%s818_s4 + $0x2] ss:$0 sm:$0xff] }
  0x3c   :  { %508 = vmatpush3.bf16.msra.mxu0 %v576_v3  ;;  %528 = vmatpush3.bf16.msra.mxu1 %v585_v8 }
  0x3d   :  { %509 = vmatprep.subr.bf16.mxu0 %v713_v0  ;;  %529 = vmatprep.subr.bf16.mxu1 %v713_v0 }
  0x40   :  { %510 = vmatpush3.bf16.msra.mxu0 %v577_v5  ;;  %530 = vmatpush3.bf16.msra.mxu1 %v586_v10 }
  0x41   :  { %511 = vmatprep.subr.bf16.mxu0 %v713_v0  ;;  %531 = vmatprep.subr.bf16.mxu1 %v713_v0 }
  0x44   :  { %512 = vmatpush3.bf16.msra.mxu0 %v578_v7  ;;  %532 = vmatpush3.bf16.msra.mxu1 %v587_v12 }
  0x45   :  { %513 = vmatprep.subr.bf16.mxu0 %v713_v0  ;;  %533 = vmatprep.subr.bf16.mxu1 %v713_v0 }
  0x48   :  { %514 = vmatpush3.bf16.msra.mxu0 %v579_v9  ;;  %534 = vmatpush3.bf16.msra.mxu1 %v588_v15 }
  0x49   :  { %515 = vmatprep.subr.bf16.mxu0 %v713_v0  ;;  %535 = vmatprep.subr.bf16.mxu1 %v713_v0 }
  0x4c   :  { %516 = vmatpush3.bf16.msra.mxu0 %v580_v11  ;;  %536 = vmatpush3.bf16.msra.mxu1 %v589_v16 }
  0x4d   :  { %517 = vmatprep.subr.bf16.mxu0 %v713_v0  ;;  %537 = vmatprep.subr.bf16.mxu1 %v713_v0 }
  0x50   :  { %518 = vmatpush3.bf16.msra.mxu0 %v581_v13  ;;  %538 = vmatpush3.bf16.msra.mxu1 %v590_v17 }
  0x51   :  { %543 = vmatprep.subr.bf16.mxu0 %v713_v0 }
  0x53   :  { %520 = vmatmul.mubr.bf16.vlgmr.msra.gmra.mxu0 %v582_v14 }
  0x54   :  { %559 = vmatprep.mubr.msk.bf16.mxu0 %vm714_vm0, %v713_v0  ;;  %544 = vmatpush3.bf16.msra.mxu0 %v591_v18 }
  0x55   :  { %545 = vmatprep.subr.bf16.mxu0 %v713_v0 }
  0x58   :  { %546 = vmatpush3.bf16.msra.mxu0 %v592_v19 }
  0x59   :  { %547 = vmatprep.subr.bf16.mxu0 %v713_v0 }
  0x5c   :  { %548 = vmatpush3.bf16.msra.mxu0 %v593_v20 }
  0x5d   :  { %549 = vmatprep.subr.bf16.mxu0 %v713_v0 }
  0x60   :  { %550 = vmatpush3.bf16.msra.mxu0 %v594_v21 }
  0x61   :  { %551 = vmatprep.subr.bf16.mxu0 %v713_v0 }
  0x64   :  { %552 = vmatpush3.bf16.msra.mxu0 %v595_v22 }
  0x65   :  { %553 = vmatprep.subr.bf16.mxu0 %v713_v0 }
  0x68   :  { %554 = vmatpush3.bf16.msra.mxu0 %v596_v33 }
  0x69   :  { %555 = vmatprep.subr.bf16.mxu0 %v713_v0 }
  0x6c   :  { %556 = vmatpush3.bf16.msra.mxu0 %v597_v34 }
  0x6d   :  { %557 = vmatprep.subr.bf16.mxu0 %v713_v0 }
  0x70   :  { %558 = vmatpush3.bf16.msra.mxu0 %v598_v35 }
 0x113   :  { %v190_v24 = vpop.f32.mrf.mxu0 }
 0x114   :  { %v191_v26 = vadd.f32 %v448_v23, %v190_v24 }
 0x115   :  { %v521_v25 = vpop.f32.mrf.mxu0 }
 0x116   :  { %v197_v30 = vmax.f32 %v191_v26, 0.0 }
 0x117   :  { %v193_v27 = vpop.f32.mrf.mxu0 }
 0x118   :  { %v194_v28 = vadd.f32 %v448_v23, %v193_v27 }
 0x119   :  { %v522_v29 = vpop.f32.mrf.mxu0 }
 0x11a   :  { %v198_v31 = vmax.f32 %v194_v28, 0.0 }
 0x11c   :  { %v199_v32 = vpack.c.bf16 %v198_v31, %v197_v30 }
 0x11e   :  { %540 = vmatmul.mubr.bf16.vlgmr.msra.gmra.mxu1 %v199_v32 }
 0x1de   :  { %v305_v37 = vpop.f32.mrf.mxu1 }
 0x1df   :  { %v306_v39 = vadd.f32 %v458_v36, %v305_v37 }
 0x1e0   :  { %v541_v38 = vpop.f32.mrf.mxu1 }
 0x1e1   :  { %v312_v43 = vmax.f32 %v306_v39, 0.0 }
 0x1e2   :  { %v308_v40 = vpop.f32.mrf.mxu1 }
 0x1e3   :  { %v309_v41 = vadd.f32 %v458_v36, %v308_v40 }
 0x1e4   :  { %v542_v42 = vpop.f32.mrf.mxu1 }
 0x1e5   :  { %v313_v44 = vmax.f32 %v309_v41, 0.0 }
 0x1e7   :  { %v314_v45 = vpack.c.bf16 %v313_v44, %v312_v43 }
 0x1e9   :  { %560 = vmatmul.mubr.bf16.vlgmr.msra.gmra.mxu0 %v314_v45 }
 0x2a9   :  { %v420_v47 = vpop.f32.mrf.mxu0 }
 0x2aa   :  { %v421_v48 = vadd.f32 %v467_v46, %v420_v47 }
 0x2ab   :  { %v561_v49 = vpop.f32.mrf.mxu0 }
 0x2ac   :  { %427 = vst [vmem:[#allocation10] sm:$0xff] %v421_v48 }
 0x2ad   :  { %v423_v50 = vpop.f32.mrf.mxu0 }
 0x2ae   :  { %v424_v51 = vadd.f32 %v467_v46, %v423_v50 }
 0x2af   :  { %v562_v52 = vpop.f32.mrf.mxu0 }
 0x2b0   :  { %428 = vst [vmem:[#allocation10 + $0x8] sm:$0xff] %v424_v51 }
 0x2b1   :  { %690 = shalt.err (!%p687_p10)
}
 0x2b2   :  { %s716_s20 = smov 128   ;;  %s717_s4 = smov 8  }
 0x2b3   :  { %440 = dma.vmem_to_hbm [thread:$0]  %s435_s18, 256, %s819_s5, [#allocation4], %s716_s20, %s716_s20, %s717_s4  }
 0x2b4   :  { %705 = dma.done.wait [#allocation4], 256  }
 0x2b5   :  { %706 = vsyncadd [#allocation4], 4294967040 }
 0x2b6   :  { %444 = vsyncpa [#allocation3], 1 }
 0x2b7   :  { %445 = vsyncpa [#allocation6], 1 }
 0x2b8   :  { %446 = vsyncpa [#allocation9], 1 }
 0x2b9   :  { %447 = vsyncpa [#allocation4], 1 }

// kernel: tpu_custom_call.1
= control target key start
LH: loop header
LB: loop body
LE: loop exit
PB: predicated region body
PF: predicated region fallthrough
CT: control target
= control target key end

     0   :  { %10 = vsyncpa [#allocation3], 0  ;;  %s814_s0 = inlined_call_operand.hbm [shape: bf16[16,128], index: 0, kind: input, shape index: {}]   ;;  %s815_s1 = inlined_call_operand.hbm [shape: bf16[128,128], index: 1, kind: input, shape index: {}]   ;;  %s816_s2 = inlined_call_operand.hbm [shape: bf16[128,128], index: 2, kind: input, shape index: {}]   ;;  %s817_s3 = inlined_call_operand.hbm [shape: bf16[128,128], index: 3, kind: input, shape index: {}]   ;;  %s818_s4 = inlined_call_operand.vmem [shape: f32[1,384], index: 4, kind: input, shape index: {}]   ;;  %s819_s5 = inlined_call_operand.hbm [shape: f32[16,128], index: 5, kind: output, shape index: {}]  }
   0x1   :  { %11 = vsyncpa [#allocation6], 0 }
   0x2   :  { %12 = vsyncpa [#allocation9], 0 }
   0x3   :  { %13 = vsyncpa [#allocation4], 0  ;;  %s707_s18 = smov [#allocation5]   ;;  %s708_s20 = smov [#allocation2]  }
   0x4   :  { %s31_s19 = sshll.u32 %s707_s18, 4  ;;  %s19_s21 = sshll.u32 %s708_s20, 4  ;;  %s32_s19 = int_to_ptr.vmem [resolvable:$true] %s31_s19  ;;  %s20_s21 = int_to_ptr.vmem [resolvable:$true] %s19_s21 }
   0x5   :  { %s607_s22 = scalar_lea.vmem %s32_s19, 1024  ;;  %p612_p1 = scmp.lt.s32.totalorder %s32_s19, %s32_s19 }
   0x6   :  { %p608_p0 = scmp.ne.s32.totalorder %s32_s19, %s607_s22  ;;  %p613_p2 = scmp.lt.s32.totalorder %s607_s22, %s607_s22 }
   0x8   :  { %p614_p3 = por %p613_p2, %p612_p1 }
   0xa   :  { %p615_p4 = pnand %p614_p3, %p608_p0 }
   0xc   :  { %618 = shalt.err (!%p615_p4)
}
   0xd   :  { %s709_s23 = smov 64   ;;  %s710_s24 = smov 4  }
   0xe   :  { %37 = dma.hbm_to_vmem [thread:$0]  %s815_s1, 1024, %s32_s19, [#allocation6], %s709_s23, %s709_s23, %s710_s24  }
   0xf   :  { %s627_s27 = scalar_lea.vmem %s20_s21, 128  ;;  %p632_p6 = scmp.lt.s32.totalorder %s20_s21, %s20_s21 }
  0x10   :  { %p628_p5 = scmp.ne.s32.totalorder %s20_s21, %s627_s27  ;;  %p633_p7 = scmp.lt.s32.totalorder %s627_s27, %s627_s27 }
  0x12   :  { %p634_p8 = por %p633_p7, %p632_p6 }
  0x14   :  { %p635_p9 = pnand %p634_p8, %p628_p5 }
  0x16   :  { %638 = shalt.err (!%p635_p9)
}
  0x17   :  { %25 = dma.hbm_to_vmem [thread:$0]  %s814_s0, 128, %s20_s21, [#allocation3], %s709_s23, %s709_s23, %s710_s24  }
  0x18   :  { %s711_s30 = smov [#allocation7]   ;;  %s712_s7 = smov [#allocation8]  }
  0x19   :  { %s43_s6 = sshll.u32 %s711_s30, 4  ;;  %s55_s8 = sshll.u32 %s712_s7, 4  ;;  %s44_s6 = int_to_ptr.vmem [resolvable:$true] %s43_s6  ;;  %s56_s8 = int_to_ptr.vmem [resolvable:$true] %s55_s8 }
  0x1a   :  { %s647_s1 = scalar_lea.vmem %s44_s6, 1024  ;;  %p652_p11 = scmp.lt.s32.totalorder %s44_s6, %s44_s6 }
  0x1b   :  { %p648_p10 = scmp.ne.s32.totalorder %s44_s6, %s647_s1  ;;  %p653_p12 = scmp.lt.s32.totalorder %s647_s1, %s647_s1 }
  0x1d   :  { %p654_p13 = por %p653_p12, %p652_p11 }
  0x1f   :  { %p655_p0 = pnand %p654_p13, %p648_p10 }
  0x21   :  { %658 = shalt.err (!%p655_p0)
}
  0x22   :  { %49 = dma.hbm_to_vmem [thread:$0]  %s816_s2, 1024, %s44_s6, [#allocation6], %s709_s23, %s709_s23, %s710_s24  }
  0x23   :  { %s667_s0 = scalar_lea.vmem %s56_s8, 1024  ;;  %p672_p2 = scmp.lt.s32.totalorder %s56_s8, %s56_s8 }
  0x24   :  { %p668_p1 = scmp.ne.s32.totalorder %s56_s8, %s667_s0  ;;  %p673_p3 = scmp.lt.s32.totalorder %s667_s0, %s667_s0 }
  0x26   :  { %p674_p4 = por %p673_p3, %p672_p2 }
  0x28   :  { %p675_p5 = pnand %p674_p4, %p668_p1 }
  0x2a   :  { %678 = shalt.err (!%p675_p5)
}
  0x2b   :  { %61 = dma.hbm_to_vmem [thread:$0]  %s817_s3, 1024, %s56_s8, [#allocation9], %s709_s23, %s709_s23, %s710_s24  }
  0x2c   :  { %699 = dma.done.wait [#allocation3], 128  }
  0x2d   :  { %700 = vsyncadd [#allocation3], 4294967168 }
  0x2e   :  { %701 = dma.done.wait [#allocation6], 2048  }
  0x2f   :  { %702 = vsyncadd [#allocation6], 4294965248 }
  0x30   :  { %703 = dma.done.wait [#allocation9], 1024  }
  0x31   :  { %704 = vsyncadd [#allocation9], 4294966272  ;;  %v713_v0 = vmov 0.0   ;;  %vm714_vm0 = vmmov 0   ;;  %v574_v1 = vld [vmem:[#allocation5 + $0x38] sm:$0xff]   ;;  %v575_v2 = vld [vmem:[#allocation5 + $0x30] sm:$0xff]  }
  0x32   :  { %503 = vmatprep.subr.bf16.mxu0 %v713_v0  ;;  %519 = vmatprep.mubr.msk.bf16.mxu0 %vm714_vm0, %v713_v0  ;;  %v576_v3 = vld [vmem:[#allocation5 + $0x28] sm:$0xff]   ;;  %v583_v4 = vld [vmem:[#allocation7 + $0x38] sm:$0xff]   ;;  %v577_v5 = vld [vmem:[#allocation5 + $0x20] sm:$0xff]   ;;  %s715_s17 = smov [#allocation10]  }
  0x33   :  { %523 = vmatprep.subr.bf16.mxu1 %v713_v0  ;;  %539 = vmatprep.mubr.msk.bf16.mxu1 %vm714_vm0, %v713_v0  ;;  %v584_v6 = vld [vmem:[#allocation7 + $0x30] sm:$0xff]   ;;  %v578_v7 = vld [vmem:[#allocation5 + $0x18] sm:$0xff]   ;;  %v585_v8 = vld [vmem:[#allocation7 + $0x28] sm:$0xff]   ;;  %s434_s18 = sshll.u32 %s715_s17, 4  ;;  %s435_s18 = int_to_ptr.vmem [resolvable:$true] %s434_s18 }
  0x34   :  { %504 = vmatpush3.bf16.msra.mxu0 %v574_v1  ;;  %524 = vmatpush3.bf16.msra.mxu1 %v583_v4  ;;  %v579_v9 = vld [vmem:[#allocation5 + $0x10] sm:$0xff]   ;;  %v586_v10 = vld [vmem:[#allocation7 + $0x20] sm:$0xff]   ;;  %v580_v11 = vld [vmem:[#allocation5 + $0x8] sm:$0xff]   ;;  %s679_s19 = scalar_lea.vmem %s435_s18, 256  ;;  %p684_p7 = scmp.lt.s32.totalorder %s435_s18, %s435_s18 }
  0x35   :  { %505 = vmatprep.subr.bf16.mxu0 %v713_v0  ;;  %525 = vmatprep.subr.bf16.mxu1 %v713_v0  ;;  %v587_v12 = vld [vmem:[#allocation7 + $0x18] sm:$0xff]   ;;  %v581_v13 = vld [vmem:[#allocation5] sm:$0xff]   ;;  %v588_v15 = vld [vmem:[#allocation7 + $0x10] sm:$0xff]   ;;  %p680_p6 = scmp.ne.s32.totalorder %s435_s18, %s679_s19  ;;  %p685_p8 = scmp.lt.s32.totalorder %s679_s19, %s679_s19 }
  0x36   :  { %v582_v14 = vld [vmem:[#allocation2] sm:$0xff]   ;;  %v589_v16 = vld [vmem:[#allocation7 + $0x8] sm:$0xff]   ;;  %v590_v17 = vld [vmem:[#allocation7] sm:$0xff]  }
  0x37   :  { %v591_v18 = vld [vmem:[#allocation8 + $0x38] sm:$0xff]   ;;  %v592_v19 = vld [vmem:[#allocation8 + $0x30] sm:$0xff]   ;;  %v593_v20 = vld [vmem:[#allocation8 + $0x28] sm:$0xff]   ;;  %p686_p9 = por %p685_p8, %p684_p7 }
  0x38   :  { %506 = vmatpush3.bf16.msra.mxu0 %v575_v2  ;;  %526 = vmatpush3.bf16.msra.mxu1 %v584_v6  ;;  %v594_v21 = vld [vmem:[#allocation8 + $0x20] sm:$0xff]   ;;  %v595_v22 = vld [vmem:[#allocation8 + $0x18] sm:$0xff]   ;;  %v596_v33 = vld [vmem:[#allocation8 + $0x10] sm:$0xff]  }
  0x39   :  { %507 = vmatprep.subr.bf16.mxu0 %v713_v0  ;;  %527 = vmatprep.subr.bf16.mxu1 %v713_v0  ;;  %v448_v23 = vld [vmem:[%s818_s4] ss:$0 sm:$0xff]  ;;  %v597_v34 = vld [vmem:[#allocation8 + $0x8] sm:$0xff]   ;;  %v598_v35 = vld [vmem:[#allocation8] sm:$0xff]   ;;  %p687_p10 = pnand %p686_p9, %p680_p6 }
  0x3a   :  { %v458_v36 = vld [vmem:[%s818_s4 + $0x1] ss:$0 sm:$0xff]  ;;  %v467_v46 = vld [vmem:[%s818_s4 + $0x2] ss:$0 sm:$0xff] }
  0x3c   :  { %508 = vmatpush3.bf16.msra.mxu0 %v576_v3  ;;  %528 = vmatpush3.bf16.msra.mxu1 %v585_v8 }
  0x3d   :  { %509 = vmatprep.subr.bf16.mxu0 %v713_v0  ;;  %529 = vmatprep.subr.bf16.mxu1 %v713_v0 }
  0x40   :  { %510 = vmatpush3.bf16.msra.mxu0 %v577_v5  ;;  %530 = vmatpush3.bf16.msra.mxu1 %v586_v10 }
  0x41   :  { %511 = vmatprep.subr.bf16.mxu0 %v713_v0  ;;  %531 = vmatprep.subr.bf16.mxu1 %v713_v0 }
  0x44   :  { %512 = vmatpush3.bf16.msra.mxu0 %v578_v7  ;;  %532 = vmatpush3.bf16.msra.mxu1 %v587_v12 }
  0x45   :  { %513 = vmatprep.subr.bf16.mxu0 %v713_v0  ;;  %533 = vmatprep.subr.bf16.mxu1 %v713_v0 }
  0x48   :  { %514 = vmatpush3.bf16.msra.mxu0 %v579_v9  ;;  %534 = vmatpush3.bf16.msra.mxu1 %v588_v15 }
  0x49   :  { %515 = vmatprep.subr.bf16.mxu0 %v713_v0  ;;  %535 = vmatprep.subr.bf16.mxu1 %v713_v0 }
  0x4c   :  { %516 = vmatpush3.bf16.msra.mxu0 %v580_v11  ;;  %536 = vmatpush3.bf16.msra.mxu1 %v589_v16 }
  0x4d   :  { %517 = vmatprep.subr.bf16.mxu0 %v713_v0  ;;  %537 = vmatprep.subr.bf16.mxu1 %v713_v0 }
  0x50   :  { %518 = vmatpush3.bf16.msra.mxu0 %v581_v13  ;;  %538 = vmatpush3.bf16.msra.mxu1 %v590_v17 }
  0x51   :  { %543 = vmatprep.subr.bf16.mxu0 %v713_v0 }
  0x53   :  { %520 = vmatmul.mubr.bf16.vlgmr.msra.gmra.mxu0 %v582_v14 }
  0x54   :  { %559 = vmatprep.mubr.msk.bf16.mxu0 %vm714_vm0, %v713_v0  ;;  %544 = vmatpush3.bf16.msra.mxu0 %v591_v18 }
  0x55   :  { %545 = vmatprep.subr.bf16.mxu0 %v713_v0 }
  0x58   :  { %546 = vmatpush3.bf16.msra.mxu0 %v592_v19 }
  0x59   :  { %547 = vmatprep.subr.bf16.mxu0 %v713_v0 }
  0x5c   :  { %548 = vmatpush3.bf16.msra.mxu0 %v593_v20 }
  0x5d   :  { %549 = vmatprep.subr.bf16.mxu0 %v713_v0 }
  0x60   :  { %550 = vmatpush3.bf16.msra.mxu0 %v594_v21 }
  0x61   :  { %551 = vmatprep.subr.bf16.mxu0 %v713_v0 }
  0x64   :  { %552 = vmatpush3.bf16.msra.mxu0 %v595_v22 }
  0x65   :  { %553 = vmatprep.subr.bf16.mxu0 %v713_v0 }
  0x68   :  { %554 = vmatpush3.bf16.msra.mxu0 %v596_v33 }
  0x69   :  { %555 = vmatprep.subr.bf16.mxu0 %v713_v0 }
  0x6c   :  { %556 = vmatpush3.bf16.msra.mxu0 %v597_v34 }
  0x6d   :  { %557 = vmatprep.subr.bf16.mxu0 %v713_v0 }
  0x70   :  { %558 = vmatpush3.bf16.msra.mxu0 %v598_v35 }
 0x113   :  { %v190_v24 = vpop.f32.mrf.mxu0 }
 0x114   :  { %v191_v26 = vadd.f32 %v448_v23, %v190_v24 }
 0x115   :  { %v521_v25 = vpop.f32.mrf.mxu0 }
 0x116   :  { %v197_v30 = vmax.f32 %v191_v26, 0.0 }
 0x117   :  { %v193_v27 = vpop.f32.mrf.mxu0 }
 0x118   :  { %v194_v28 = vadd.f32 %v448_v23, %v193_v27 }
 0x119   :  { %v522_v29 = vpop.f32.mrf.mxu0 }
 0x11a   :  { %v198_v31 = vmax.f32 %v194_v28, 0.0 }
 0x11c   :  { %v199_v32 = vpack.c.bf16 %v198_v31, %v197_v30 }
 0x11e   :  { %540 = vmatmul.mubr.bf16.vlgmr.msra.gmra.mxu1 %v199_v32 }
 0x1de   :  { %v305_v37 = vpop.f32.mrf.mxu1 }
 0x1df   :  { %v306_v39 = vadd.f32 %v458_v36, %v305_v37 }
 0x1e0   :  { %v541_v38 = vpop.f32.mrf.mxu1 }
 0x1e1   :  { %v312_v43 = vmax.f32 %v306_v39, 0.0 }
 0x1e2   :  { %v308_v40 = vpop.f32.mrf.mxu1 }
 0x1e3   :  { %v309_v41 = vadd.f32 %v458_v36, %v308_v40 }
 0x1e4   :  { %v542_v42 = vpop.f32.mrf.mxu1 }
 0x1e5   :  { %v313_v44 = vmax.f32 %v309_v41, 0.0 }
 0x1e7   :  { %v314_v45 = vpack.c.bf16 %v313_v44, %v312_v43 }
 0x1e9   :  { %560 = vmatmul.mubr.bf16.vlgmr.msra.gmra.mxu0 %v314_v45 }
 0x2a9   :  { %v420_v47 = vpop.f32.mrf.mxu0 }
 0x2aa   :  { %v421_v48 = vadd.f32 %v467_v46, %v420_v47 }
 0x2ab   :  { %v561_v49 = vpop.f32.mrf.mxu0 }
 0x2ac   :  { %427 = vst [vmem:[#allocation10] sm:$0xff] %v421_v48 }
 0x2ad   :  { %v423_v50 = vpop.f32.mrf.mxu0 }
 0x2ae   :  { %v424_v51 = vadd.f32 %v467_v46, %v423_v50 }
 0x2af   :  { %v562_v52 = vpop.f32.mrf.mxu0 }
 0x2b0   :  { %428 = vst [vmem:[#allocation10 + $0x8] sm:$0xff] %v424_v51 }
 0x2b1   :  { %690 = shalt.err (!%p687_p10)
}
 0x2b2   :  { %s716_s20 = smov 128   ;;  %s717_s4 = smov 8  }
 0x2b3   :  { %440 = dma.vmem_to_hbm [thread:$0]  %s435_s18, 256, %s819_s5, [#allocation4], %s716_s20, %s716_s20, %s717_s4  }
 0x2b4   :  { %705 = dma.done.wait [#allocation4], 256  }
 0x2b5   :  { %706 = vsyncadd [#allocation4], 4294967040 }
 0x2b6   :  { %444 = vsyncpa [#allocation3], 1 }
 0x2b7   :  { %445 = vsyncpa [#allocation6], 1 }
 0x2b8   :  { %446 = vsyncpa [#allocation9], 1 }
 0x2b9   :  { %447 = vsyncpa [#allocation4], 1 }

</bundles_post_ra>
